<compile_context>
chip_gen: v5e
topology: v5e:2x2
jax: 0.10.0
libtpu: 0.0.40
codegen_flags: <defaults>
</compile_context>

<pallas_src>
import functools

import jax
import jax.numpy as jnp
from jax.experimental import pallas as pl
from jax.experimental.pallas import tpu as pltpu

INPUT_SIZE = len(['ID'] + [f'DATA_{i}' for i in range(8)])   # 9
NUM_LABELS = 2
NUM_CATEGORIES = 3
NUM_SPECIFIC_CLASSES = 6
HEADS_TOTAL = NUM_LABELS + NUM_CATEGORIES + NUM_SPECIFIC_CLASSES  # 11
H1 = 128
H2 = 64

# Default batch tile.  Per-tile VMEM footprint at TB=4096 (x f32 [TB,9] +
# h f32 [TB,128] + fused out f32 [TB,11], double-buffered I/O + resident
# weights ~40 KiB) is ~5 MiB, comfortably inside v5e's 16 MiB scoped default
# and v7x's 64 MiB physical VMEM.
TB_DEFAULT = 4096


def _round_up(n, m):
    return ((n + m - 1) // m) * m


def _mtnn_kernel(x_ref,
                 w1_ref, b1_ref,
                 w2_ref, b2_ref,
                 wh_ref, bh_ref,
                 out_ref):
    # Activations cast to bf16 for the MXU; accumulate in f32.
    x = x_ref[...].astype(jnp.bfloat16)

    # fc1 + relu : [TB, 9] @ [9, 128]
    h = jnp.dot(x, w1_ref[...], preferred_element_type=jnp.float32) + b1_ref[...]
    h = jnp.maximum(h, 0.0).astype(jnp.bfloat16)

    # fc2 + relu : [TB, 128] @ [128, 64]
    h = jnp.dot(h, w2_ref[...], preferred_element_type=jnp.float32) + b2_ref[...]
    h = jnp.maximum(h, 0.0).astype(jnp.bfloat16)

    # fused output heads : [TB, 64] @ [64, 11] -> [TB, 11]
    out_ref[...] = (
        jnp.dot(h, wh_ref[...], preferred_element_type=jnp.float32) + bh_ref[...]
    )


def pack_params(params):
    """One-time param prep: fuse the 3 heads and cast matmul weights to bf16."""
    wh = jnp.concatenate([params['w3'], params['w4'], params['w5']], axis=1)
    bh = jnp.concatenate([params['b3'], params['b4'], params['b5']], axis=1)
    return dict(
        w1=params['w1'].astype(jnp.bfloat16), b1=params['b1'].astype(jnp.float32),
        w2=params['w2'].astype(jnp.bfloat16), b2=params['b2'].astype(jnp.float32),
        wh=wh.astype(jnp.bfloat16),           bh=bh.astype(jnp.float32),
    )


@functools.partial(jax.jit, static_argnames=("tb",))
def multitask_nn_forward(x, packed, tb=TB_DEFAULT):
    """x: [B, INPUT_SIZE] float32.  packed: output of pack_params.

    Returns (label_out [B,2], category_out [B,3], specific_class_out [B,6])."""
    B = x.shape[0]
    tb = min(tb, _round_up(B, 8))          # second-to-last block dim must be %8
    grid = (pl.cdiv(B, tb),)

    # Weights / biases use a constant index_map -> DMA'd once, VMEM-resident.
    def resident(shape):
        return pl.BlockSpec(shape, lambda i: (0, 0))

    fused = pl.pallas_call(
        _mtnn_kernel,
        out_shape=jax.ShapeDtypeStruct((B, HEADS_TOTAL), jnp.float32),
        grid=grid,
        in_specs=[
            pl.BlockSpec((tb, INPUT_SIZE), lambda i: (i, 0)),         # x tile
            resident((INPUT_SIZE, H1)), resident((1, H1)),            # w1, b1
            resident((H1, H2)),         resident((1, H2)),            # w2, b2
            resident((H2, HEADS_TOTAL)), resident((1, HEADS_TOTAL)),  # fused heads
        ],
        out_specs=pl.BlockSpec((tb, HEADS_TOTAL), lambda i: (i, 0)),
        compiler_params=pltpu.CompilerParams(
            dimension_semantics=("parallel",),   # shard batch tiles across TCs (v7x)
        ),
    )(
        x,
        packed['w1'], packed['b1'],
        packed['w2'], packed['b2'],
        packed['wh'], packed['bh'],
    )

    label_out = fused[:, :NUM_LABELS]
    category_out = fused[:, NUM_LABELS:NUM_LABELS + NUM_CATEGORIES]
    specific_class_out = fused[:, NUM_LABELS + NUM_CATEGORIES:]
    return label_out, category_out, specific_class_out


def init_params(key):
    """Deterministic init mimicking nn.Linear's U(-1/sqrt(fan_in), 1/sqrt(fan_in)).
    Weights are stored transposed: [in_features, out_features]."""
    def linear(key, fan_in, fan_out):
        kw, kb = jax.random.split(key)
        bound = 1.0 / jnp.sqrt(fan_in)
        w = jax.random.uniform(kw, (fan_in, fan_out), jnp.float32, -bound, bound)
        b = jax.random.uniform(kb, (1, fan_out), jnp.float32, -bound, bound)
        return w, b

    k1, k2, k3, k4, k5 = jax.random.split(key, 5)
    w1, b1 = linear(k1, INPUT_SIZE, H1)
    w2, b2 = linear(k2, H1, H2)
    w3, b3 = linear(k3, H2, NUM_LABELS)
    w4, b4 = linear(k4, H2, NUM_CATEGORIES)
    w5, b5 = linear(k5, H2, NUM_SPECIFIC_CLASSES)
    return dict(w1=w1, b1=b1, w2=w2, b2=b2, w3=w3, b3=b3,
                w4=w4, b4=b4, w5=w5, b5=b5)


def reference_forward(x, p):
    """Pure-JAX reference mirroring the kernel's bf16-operand / f32-accumulate
    numerics (so the comparison isolates kernel bugs, not dtype rounding)."""
    hi = jax.lax.Precision.HIGHEST
    bf = lambda a: a.astype(jnp.bfloat16).astype(jnp.float32)

    h = jnp.maximum(jnp.dot(bf(x), bf(p['w1']), precision=hi) + p['b1'], 0.0)
    h = jnp.maximum(jnp.dot(bf(h), bf(p['w2']), precision=hi) + p['b2'], 0.0)
    hb = bf(h)
    return (jnp.dot(hb, bf(p['w3']), precision=hi) + p['b3'],
            jnp.dot(hb, bf(p['w4']), precision=hi) + p['b4'],
            jnp.dot(hb, bf(p['w5']), precision=hi) + p['b5'])


if __name__ == "__main__":
    key = jax.random.PRNGKey(0)
    kx, kp = jax.random.split(key)

    B = 8
    x = jax.random.normal(kx, (B, INPUT_SIZE), jnp.float32)
    params = init_params(kp)
    packed = pack_params(params)

    outs = multitask_nn_forward(x, packed)
    outs = jax.block_until_ready(outs)

    refs = reference_forward(x, params)
    names = ("label_out", "category_out", "specific_class_out")
    for name, o, r in zip(names, outs, refs):
        assert o.shape == r.shape, f"{name}: shape {o.shape} vs {r.shape}"
        assert jnp.allclose(o, r, atol=5e-3, rtol=5e-3), f"{name}: mismatch vs reference"

    print("KERNEL_OK")
</pallas_src>

<mosaic_0001>
module attributes {stable_mosaic.version = 11 : i64} {
  func.func @_mtnn_kernel(%arg0: i32, %arg1: memref<8x9xf32, #tpu.memory_space<vmem>>, %arg2: memref<9x128xbf16, #tpu.memory_space<vmem>>, %arg3: memref<1x128xf32, #tpu.memory_space<vmem>>, %arg4: memref<128x64xbf16, #tpu.memory_space<vmem>>, %arg5: memref<1x64xf32, #tpu.memory_space<vmem>>, %arg6: memref<64x11xbf16, #tpu.memory_space<vmem>>, %arg7: memref<1x11xf32, #tpu.memory_space<vmem>>, %arg8: memref<8x11xf32, #tpu.memory_space<vmem>>) attributes {dimension_semantics = [#tpu.dimension_semantics<parallel>], iteration_bounds = array<i64: 1>, scalar_prefetch = 0 : i64, scratch_operands = 0 : i64, tpu.core_type = #tpu.core_type<tc>, window_params = [{transform_indices = @transform_0, window_bounds = array<i64: 8, 9>}, {pipeline_mode = #tpu.pipeline_mode<synchronous>, transform_indices = @transform_1, window_bounds = array<i64: 9, 128>}, {pipeline_mode = #tpu.pipeline_mode<synchronous>, transform_indices = @transform_2, window_bounds = array<i64: 1, 128>}, {pipeline_mode = #tpu.pipeline_mode<synchronous>, transform_indices = @transform_3, window_bounds = array<i64: 128, 64>}, {pipeline_mode = #tpu.pipeline_mode<synchronous>, transform_indices = @transform_4, window_bounds = array<i64: 1, 64>}, {pipeline_mode = #tpu.pipeline_mode<synchronous>, transform_indices = @transform_5, window_bounds = array<i64: 64, 11>}, {pipeline_mode = #tpu.pipeline_mode<synchronous>, transform_indices = @transform_6, window_bounds = array<i64: 1, 11>}, {transform_indices = @transform_7, window_bounds = array<i64: 8, 11>}]} {
    %c0 = arith.constant 0 : index
    %c0_0 = arith.constant 0 : index
    %0 = vector.load %arg1[%c0, %c0_0] : memref<8x9xf32, #tpu.memory_space<vmem>>, vector<8x9xf32>
    %1 = arith.truncf %0 : vector<8x9xf32> to vector<8x9xbf16>
    %c0_1 = arith.constant 0 : index
    %c0_2 = arith.constant 0 : index
    %2 = vector.load %arg2[%c0_1, %c0_2] : memref<9x128xbf16, #tpu.memory_space<vmem>>, vector<9x128xbf16>
    %cst = arith.constant dense<0.000000e+00> : vector<8x128xf32>
    %3 = tpu.matmul %1, %2, %cst {dimension_numbers = #tpu.dot_dimension_numbers<[1], [0], [0], [1], [0, 0, 1, 1], [], []>} : vector<8x9xbf16>, vector<9x128xbf16>, vector<8x128xf32> -> vector<8x128xf32>
    %c0_3 = arith.constant 0 : index
    %c0_4 = arith.constant 0 : index
    %4 = vector.load %arg3[%c0_3, %c0_4] : memref<1x128xf32, #tpu.memory_space<vmem>>, vector<1x128xf32>
    %5 = vector.broadcast %4 : vector<1x128xf32> to vector<8x128xf32>
    %6 = arith.addf %3, %5 : vector<8x128xf32>
    %cst_5 = arith.constant 0.000000e+00 : f32
    %7 = vector.broadcast %cst_5 : f32 to vector<8x128xf32>
    %8 = arith.maximumf %6, %7 : vector<8x128xf32>
    %9 = arith.truncf %8 : vector<8x128xf32> to vector<8x128xbf16>
    %c0_6 = arith.constant 0 : index
    %c0_7 = arith.constant 0 : index
    %10 = vector.load %arg4[%c0_6, %c0_7] : memref<128x64xbf16, #tpu.memory_space<vmem>>, vector<128x64xbf16>
    %cst_8 = arith.constant dense<0.000000e+00> : vector<8x64xf32>
    %11 = tpu.matmul %9, %10, %cst_8 {dimension_numbers = #tpu.dot_dimension_numbers<[1], [0], [0], [1], [0, 0, 1, 1], [], []>} : vector<8x128xbf16>, vector<128x64xbf16>, vector<8x64xf32> -> vector<8x64xf32>
    %c0_9 = arith.constant 0 : index
    %c0_10 = arith.constant 0 : index
    %12 = vector.load %arg5[%c0_9, %c0_10] : memref<1x64xf32, #tpu.memory_space<vmem>>, vector<1x64xf32>
    %13 = vector.broadcast %12 : vector<1x64xf32> to vector<8x64xf32>
    %14 = arith.addf %11, %13 : vector<8x64xf32>
    %cst_11 = arith.constant 0.000000e+00 : f32
    %15 = vector.broadcast %cst_11 : f32 to vector<8x64xf32>
    %16 = arith.maximumf %14, %15 : vector<8x64xf32>
    %17 = arith.truncf %16 : vector<8x64xf32> to vector<8x64xbf16>
    %c0_12 = arith.constant 0 : index
    %c0_13 = arith.constant 0 : index
    %18 = vector.load %arg6[%c0_12, %c0_13] : memref<64x11xbf16, #tpu.memory_space<vmem>>, vector<64x11xbf16>
    %cst_14 = arith.constant dense<0.000000e+00> : vector<8x11xf32>
    %19 = tpu.matmul %17, %18, %cst_14 {dimension_numbers = #tpu.dot_dimension_numbers<[1], [0], [0], [1], [0, 0, 1, 1], [], []>} : vector<8x64xbf16>, vector<64x11xbf16>, vector<8x11xf32> -> vector<8x11xf32>
    %c0_15 = arith.constant 0 : index
    %c0_16 = arith.constant 0 : index
    %20 = vector.load %arg7[%c0_15, %c0_16] : memref<1x11xf32, #tpu.memory_space<vmem>>, vector<1x11xf32>
    %21 = vector.broadcast %20 : vector<1x11xf32> to vector<8x11xf32>
    %22 = arith.addf %19, %21 : vector<8x11xf32>
    %c0_17 = arith.constant 0 : index
    %c0_18 = arith.constant 0 : index
    %23 = vector.load %arg8[%c0_17, %c0_18] : memref<8x11xf32, #tpu.memory_space<vmem>>, vector<8x11xf32>
    tpu.vector_store %arg8[%c0_17, %c0_18], %22 {strides = array<i32>} : memref<8x11xf32, #tpu.memory_space<vmem>>, vector<8x11xf32>,
    return
  }
  func.func @transform_0(%arg0: i32) -> (i32, i32) {
    %c0_i32 = arith.constant 0 : i32
    %c0_i32_0 = arith.constant 0 : i32
    return %arg0, %c0_i32 : i32, i32
  }
  func.func @transform_1(%arg0: i32) -> (i32, i32) {
    %c0_i32 = arith.constant 0 : i32
    %c0_i32_0 = arith.constant 0 : i32
    %c0_i32_1 = arith.constant 0 : i32
    return %c0_i32, %c0_i32_0 : i32, i32
  }
  func.func @transform_2(%arg0: i32) -> (i32, i32) {
    %c0_i32 = arith.constant 0 : i32
    %c0_i32_0 = arith.constant 0 : i32
    %c0_i32_1 = arith.constant 0 : i32
    return %c0_i32, %c0_i32_0 : i32, i32
  }
  func.func @transform_3(%arg0: i32) -> (i32, i32) {
    %c0_i32 = arith.constant 0 : i32
    %c0_i32_0 = arith.constant 0 : i32
    %c0_i32_1 = arith.constant 0 : i32
    return %c0_i32, %c0_i32_0 : i32, i32
  }
  func.func @transform_4(%arg0: i32) -> (i32, i32) {
    %c0_i32 = arith.constant 0 : i32
    %c0_i32_0 = arith.constant 0 : i32
    %c0_i32_1 = arith.constant 0 : i32
    return %c0_i32, %c0_i32_0 : i32, i32
  }
  func.func @transform_5(%arg0: i32) -> (i32, i32) {
    %c0_i32 = arith.constant 0 : i32
    %c0_i32_0 = arith.constant 0 : i32
    %c0_i32_1 = arith.constant 0 : i32
    return %c0_i32, %c0_i32_0 : i32, i32
  }
  func.func @transform_6(%arg0: i32) -> (i32, i32) {
    %c0_i32 = arith.constant 0 : i32
    %c0_i32_0 = arith.constant 0 : i32
    %c0_i32_1 = arith.constant 0 : i32
    return %c0_i32, %c0_i32_0 : i32, i32
  }
  func.func @transform_7(%arg0: i32) -> (i32, i32) {
    %c0_i32 = arith.constant 0 : i32
    %c0_i32_0 = arith.constant 0 : i32
    return %arg0, %c0_i32 : i32, i32
  }
}

</mosaic_0001>

<bundles_post_ra>
// kernel: multitask_nn_forward.1
= control target key start
LH: loop header
LB: loop body
LE: loop exit
PB: predicated region body
PF: predicated region fallthrough
CT: control target
= control target key end

     0   :  { %vm44_vm0 = vcmask 1043456   ;;  %vm45_vm1 = vcmask 1044480   ;;  %v279_v2 = vmov 65535   ;;  %vm40_vm2 = vcmask 72704   ;;  %s377_s1 = inlined_call_operand.vmem [shape: bf16[9,128], index: 1, kind: input, shape index: {}]   ;;  %s378_s0 = inlined_call_operand.vmem [shape: f32[8,9], index: 0, kind: input, shape index: {}]   ;;  %s379_s3 = inlined_call_operand.vmem [shape: bf16[128,64], index: 3, kind: input, shape index: {}]   ;;  %s380_s2 = inlined_call_operand.vmem [shape: f32[1,128], index: 2, kind: input, shape index: {}]   ;;  %s381_s4 = inlined_call_operand.vmem [shape: f32[1,64], index: 4, kind: input, shape index: {}]   ;;  %s382_s5 = inlined_call_operand.vmem [shape: bf16[64,11], index: 5, kind: input, shape index: {}]   ;;  %s383_s6 = inlined_call_operand.vmem [shape: f32[1,11], index: 6, kind: input, shape index: {}]   ;;  %s384_s7 = inlined_call_operand.vmem [shape: f32[8,11], index: 7, kind: output, shape index: {}]  }
   0x1   :  { %v210_v0 = vld [vmem:[%s377_s1] sm:$0xf]  ;;  %v262_v1 = vld [vmem:[%s377_s1] sm:$0x10]  ;;  %v46_v3 = vsel %vm44_vm0, 4294967295, %v279_v2  ;;  %v270_v7 = vld [vmem:[%s379_s3 + $0x38] sm:$0xff] }
   0x2   :  { %v211_v4 = vor.u32 %v262_v1, %v210_v0  ;;  %v47_v5 = vsel %vm45_vm1, %v46_v3, 0  ;;  %v27_v6 = vld [vmem:[%s378_s0] sm:$0xff]  ;;  %134 = vmatpush.bf16.msra.mxu1 %v270_v7  ;;  %v269_v9 = vld [vmem:[%s379_s3 + $0x30] sm:$0xff]  ;;  %v268_v11 = vld [vmem:[%s379_s3 + $0x28] sm:$0xff]  ;;  %vm185_vm3 = vcmask 523264   ;;  %vm202_vm4 = vcmask 89088  }
   0x3   :  { %v28_v10 = vpack.c.bf16 %v27_v6, %v27_v6  ;;  %v267_v12 = vld [vmem:[%s379_s3 + $0x20] sm:$0xff]  ;;  %v266_v13 = vld [vmem:[%s379_s3 + $0x18] sm:$0xff]  ;;  %v265_v14 = vld [vmem:[%s379_s3 + $0x10] sm:$0xff] }
   0x4   :  { %v49_v8 = vand.u32 %v211_v4, %v47_v5  ;;  %v264_v15 = vld [vmem:[%s379_s3 + $0x8] sm:$0xff]  ;;  %v263_v16 = vld [vmem:[%s379_s3] sm:$0xff]  ;;  %v274_v17 = vld [vmem:[%s382_s5 + $0x18] sm:$0xff] }
   0x5   :  { %193 = vmatpush.bf16.msra.mxu2 %v274_v17  ;;  %v273_v18 = vld [vmem:[%s382_s5 + $0x10] sm:$0xff]  ;;  %v276_v19 = vld [vmem:[%s380_s2] ss:$0 sm:$0xff]  ;;  %v272_v25 = vld [vmem:[%s382_s5 + $0x8] sm:$0xff] }
   0x6   :  { %58 = vmatpush.bf16.msra.mxu0 %v49_v8  ;;  %135 = vmatpush.bf16.msra.mxu1 %v269_v9  ;;  %v271_v26 = vld [vmem:[%s382_s5] sm:$0xff] }
   0x7   :  { %v277_v27 = vld [vmem:[%s381_s4] ss:$0 sm:$0xff] }
   0x8   :  { %v278_v33 = vld [vmem:[%s383_s6] ss:$0 sm:$0xff] }
   0x9   :  { %212 = vmatmul.msk.bf16.vlgmr.msra.gmra.mxu0 %vm40_vm2, %v28_v10  ;;  %194 = vmatpush.bf16.msra.mxu2 %v273_v18 }
   0xa   :  { %136 = vmatpush.bf16.msra.mxu1 %v268_v11 }
   0xd   :  { %195 = vmatpush.bf16.msra.mxu2 %v272_v25 }
   0xe   :  { %137 = vmatpush.bf16.msra.mxu1 %v267_v12 }
  0x11   :  { %196 = vmatpush.bf16.msra.mxu2 %v271_v26 }
  0x12   :  { %138 = vmatpush.bf16.msra.mxu1 %v266_v13 }
  0x16   :  { %139 = vmatpush.bf16.msra.mxu1 %v265_v14 }
  0x1a   :  { %140 = vmatpush.bf16.msra.mxu1 %v264_v15 }
  0x1e   :  { %141 = vmatpush.bf16.msra.mxu1 %v263_v16 }
  0x86   :  { %v60_v20 = vpop.f32.mrf.mxu0 }
  0x87   :  { %v61_v21 = vadd.f32 %v276_v19, %v60_v20 }
  0x89   :  { %v64_v22 = vmax.f32 %v61_v21, 0.0 }
  0x8b   :  { %v65_v23 = vpack.c.bf16 %v64_v22, %v64_v22 }
  0x8d   :  { %142 = vmatmul.bf16.vlgmr.msra.gmra.mxu1 %v65_v23 }
  0x8e   :  { %v62_v24 = vpop.f32.mrf.mxu0 }
 0x10a   :  { %v143_v28 = vpop.f32.mrf.mxu1 }
 0x10b   :  { %v144_v29 = vadd.f32 %v277_v27, %v143_v28 }
 0x10d   :  { %v147_v30 = vmax.f32 %v144_v29, 0.0 }
 0x10f   :  { %v148_v31 = vpack.c.bf16 %v147_v30, %v147_v30 }
 0x111   :  { %261 = vmatmul.msk.bf16.vlgmr.msra.gmra.mxu2 %vm185_vm3, %v148_v31 }
 0x112   :  { %v145_v32 = vpop.f32.mrf.mxu1 }
 0x194   :  { %v198_v34 = vpop.f32.mrf.mxu2 }
 0x195   :  { %v199_v35 = vadd.f32 %v278_v33, %v198_v34 }
 0x197   :  { %203 = vst.msk [vmem:[%s384_s7] sm:$0xff] %vm202_vm4, %v199_v35 }
 0x19c   :  { %v200_v36 = vpop.f32.mrf.mxu2 }

</bundles_post_ra>
